<compile_context>
chip_gen: v7x
topology: tpu7x:2x2x1
jax: 0.10.0
libtpu: 0.0.40
codegen_flags: <defaults>
</compile_context>

<pallas_src>
import jax
import jax.numpy as jnp
from jax.experimental import pallas as pl
from jax.experimental.pallas import tpu as pltpu


LANE = 128  # TPU lane width; Cout is padded/tiled to this for lane-dense stores.


# ----------------------------- Pallas kernels ------------------------------ #

def _conv3x3_bnstats_kernel(x_ref, halo_ref, w_ref, o_ref, sum_ref, sq_ref):
    """3x3 'same' conv (stride=1, dil=1, no bias) + per-block BN partial stats.

    Grid: (N, row_blocks, cout_tiles) -- all axes "parallel".
      x_ref    : (1, TR, W, Cin)    bf16  rows of the current spatial block
      halo_ref : (1, 1, 2, W, Cin)  bf16  row above / row below (zeros at edges)
      w_ref    : (9*Cin, TCO)       bf16  weights flattened (kh, kw, cin) -> K
      o_ref    : (1, TR*W, TCO)     bf16  conv out, spatially flattened (lane-dense)
      sum_ref  : (1, 1, 1, TCO)     f32   per-(image, row-block) channel sum
      sq_ref   : (1, 1, 1, TCO)     f32   per-(image, row-block) channel sum-of-sq
    """
    TR, W, Cin = x_ref.shape[1], x_ref.shape[2], x_ref.shape[3]
    TCO = o_ref.shape[2]

    xk = x_ref[...].reshape(TR, W, Cin)
    halo = halo_ref[...].reshape(2, W, Cin)

    # Rows [-1 .. TR] of this block (pad=1 halo rows come from the side input).
    rows = jnp.concatenate([halo[0:1], xk, halo[1:2]], axis=0)          # (TR+2, W, Cin)

    # im2col slab, K ordered (kh, kw, cin) to match w_ref's flattening.
    zcol = jnp.zeros((TR + 2, 1, Cin), rows.dtype)
    xw = jnp.concatenate([zcol, rows, zcol], axis=1)                    # (TR+2, W+2, Cin)
    kw_taps = jnp.concatenate(
        [xw[:, 0:W], xw[:, 1:W + 1], xw[:, 2:W + 2]], axis=2)           # (TR+2, W, 3*Cin)
    slab = jnp.concatenate(
        [kw_taps[0:TR], kw_taps[1:TR + 1], kw_taps[2:TR + 2]], axis=2)  # (TR, W, 9*Cin)

    # One MXU matmul (bf16 x bf16 -> f32 accumulate), K = 9*Cin.
    acc = jnp.dot(slab.reshape(TR * W, 9 * Cin), w_ref[...],
                  preferred_element_type=jnp.float32)                   # (TR*W, TCO) f32

    # Lane-dense bf16 store of the conv intermediate.
    o_ref[...] = acc.astype(o_ref.dtype).reshape(1, TR * W, TCO)

    # BN partial statistics in f32 (reduced over (N, row_blocks) in the wrapper).
    sum_ref[...] = jnp.sum(acc, axis=0).reshape(1, 1, 1, TCO)
    sq_ref[...] = jnp.sum(acc * acc, axis=0).reshape(1, 1, 1, TCO)


def _bn_relu_kernel(y_ref, scale_ref, bias_ref, o_ref):
    """out = max(y * scale + bias, 0); bf16 in/out (in place), math in f32."""
    y = y_ref[...].astype(jnp.float32)           # (1, THW, TCO)
    s = scale_ref[...].reshape(1, 1, -1)         # (1, 1, TCO) f32
    b = bias_ref[...].reshape(1, 1, -1)
    o_ref[...] = jnp.maximum(y * s + b, 0.0).astype(o_ref.dtype)


# ------------------------------- Wrapper ----------------------------------- #

def _pick_row_block(H, W):
    """Rows per spatial block: a divisor of H, (rows*W) a multiple of 16 (bf16
    sublane tile), sized so the (rows*W, 128) bf16 output block stays <= ~1 MiB."""
    budget_rows = max(1, (1 << 20) // (W * LANE * 2))
    cands = [tr for tr in range(1, H) if H % tr == 0
             and (tr * W) % 16 == 0 and tr <= budget_rows]
    return max(cands) if cands else H


def _pick_hw_block(HW, target=2048):
    """Spatial tile for the elementwise BN+ReLU pass (multiple of 16, <= target)."""
    cands = [d for d in range(16, min(target, HW) + 1, 16) if HW % d == 0]
    return max(cands) if cands else HW


def conv_bn_relu(x_nchw, weight_oihw, gamma, beta, eps=1e-5):
    """Matches ConvBnReLU.forward with the module in training mode (BN batch stats).

    Conv runs on the MXU in bf16 with f32 accumulation; BN statistics and the
    affine are f32.  Returns f32 NCHW.
    """
    # TODO(synk): only the module defaults (3x3, stride=1, pad=1, dilation=1,
    # bias=False) are implemented.
    assert weight_oihw.shape[2] == 3 and weight_oihw.shape[3] == 3

    # TODO(synk): for multi-layer nets keep NHWC + padded Cout end-to-end so these
    # wrapper transposes and the final slice/cast pass vanish.
    x = jnp.transpose(x_nchw, (0, 2, 3, 1)).astype(jnp.bfloat16)        # N, H, W, Cin
    w = jnp.transpose(weight_oihw, (2, 3, 1, 0)).astype(jnp.bfloat16)   # 3, 3, Cin, Cout

    N, H, W, Cin = x.shape
    Cout = w.shape[-1]

    # Pad Cout to a multiple of 128 lanes: lane-dense stores, 128-wide MXU N-dim.
    Cpad = ((Cout + LANE - 1) // LANE) * LANE
    J = Cpad // LANE
    if Cpad != Cout:
        w = jnp.pad(w, ((0, 0), (0, 0), (0, 0), (0, Cpad - Cout)))
    w2d = w.reshape(9 * Cin, Cpad)                                      # K = (kh, kw, cin)

    # Spatial row blocks + 1-row halos (tiny side input: 2 rows per block).
    TR = _pick_row_block(H, W)
    RB = H // TR
    xb = x.reshape(N, RB, TR, W, Cin)
    zrow = jnp.zeros((N, 1, W, Cin), x.dtype)
    top = jnp.concatenate([zrow, xb[:, :-1, TR - 1]], axis=1)           # row above each block
    bot = jnp.concatenate([xb[:, 1:, 0], zrow], axis=1)                 # row below each block
    halo = jnp.stack([top, bot], axis=2)                                # (N, RB, 2, W, Cin)

    # --- fused conv3x3 (im2col, single bf16 MXU matmul) + BN partial stats ---
    # Per-step VMEM is bounded by the row block; raise vmem_limit_bytes / enlarge
    # blocks on v6e if desired (not needed at these sizes).
    conv_flat, sums, sqs = pl.pallas_call(
        _conv3x3_bnstats_kernel,
        out_shape=(
            jax.ShapeDtypeStruct((N, H * W, Cpad), jnp.bfloat16),
            jax.ShapeDtypeStruct((N, RB, 1, Cpad), jnp.float32),
            jax.ShapeDtypeStruct((N, RB, 1, Cpad), jnp.float32),
        ),
        grid=(N, RB, J),
        in_specs=[
            pl.BlockSpec((1, TR, W, Cin), lambda n, r, j: (n, r, 0, 0)),
            pl.BlockSpec((1, 1, 2, W, Cin), lambda n, r, j: (n, r, 0, 0, 0)),
            pl.BlockSpec((9 * Cin, LANE), lambda n, r, j: (0, j)),
        ],
        out_specs=(
            pl.BlockSpec((1, TR * W, LANE), lambda n, r, j: (n, r, j)),
            pl.BlockSpec((1, 1, 1, LANE), lambda n, r, j: (n, r, 0, j)),
            pl.BlockSpec((1, 1, 1, LANE), lambda n, r, j: (n, r, 0, j)),
        ),
        compiler_params=pltpu.CompilerParams(
            dimension_semantics=("parallel", "parallel", "parallel")),
    )(x, halo, w2d)

    # BN scale/bias from batch statistics (biased variance, as PyTorch normalizes).
    count = float(N * H * W)
    mean = jnp.sum(sums, axis=(0, 1, 2)) / count                        # (Cpad,)
    var = jnp.maximum(jnp.sum(sqs, axis=(0, 1, 2)) / count - mean * mean, 0.0)
    gamma_p = jnp.pad(gamma.astype(jnp.float32), (0, Cpad - Cout))
    beta_p = jnp.pad(beta.astype(jnp.float32), (0, Cpad - Cout))
    scale = gamma_p * jax.lax.rsqrt(var + eps)
    bias = beta_p - mean * scale
    scale = scale.reshape(1, Cpad)
    bias = bias.reshape(1, Cpad)

    # --- fused BN affine + ReLU, tiled over H*W, written in place (bf16) ---
    THW = _pick_hw_block(H * W)
    T = (H * W) // THW
    out_flat = pl.pallas_call(
        _bn_relu_kernel,
        out_shape=jax.ShapeDtypeStruct((N, H * W, Cpad), jnp.bfloat16),
        grid=(N, T, J),
        in_specs=[
            pl.BlockSpec((1, THW, LANE), lambda n, t, j: (n, t, j)),
            pl.BlockSpec((1, LANE), lambda n, t, j: (0, j)),
            pl.BlockSpec((1, LANE), lambda n, t, j: (0, j)),
        ],
        out_specs=pl.BlockSpec((1, THW, LANE), lambda n, t, j: (n, t, j)),
        input_output_aliases={0: 0},
        compiler_params=pltpu.CompilerParams(
            dimension_semantics=("parallel", "parallel", "parallel")),
    )(conv_flat, scale, bias)

    out = out_flat.reshape(N, H, W, Cpad)[:, :, :, :Cout].astype(jnp.float32)
    return jnp.transpose(out, (0, 3, 1, 2))                             # back to NCHW


# --------------------------- Pure-JAX reference ----------------------------- #

def _reference(x_nchw, weight_oihw, gamma, beta, eps=1e-5):
    y = jax.lax.conv_general_dilated(
        x_nchw, weight_oihw, window_strides=(1, 1), padding=((1, 1), (1, 1)),
        dimension_numbers=("NCHW", "OIHW", "NCHW"))
    mean = jnp.mean(y, axis=(0, 2, 3), keepdims=True)
    var = jnp.mean((y - mean) ** 2, axis=(0, 2, 3), keepdims=True)
    yn = (y - mean) / jnp.sqrt(var + eps)
    yn = yn * gamma.reshape(1, -1, 1, 1) + beta.reshape(1, -1, 1, 1)
    return jnp.maximum(yn, 0.0)


if __name__ == "__main__":
    key = jax.random.PRNGKey(0)
    k_x, k_w = jax.random.split(key)

    N, Cin, H, W = 2, 4, 16, 16
    Cout = 8

    x = jax.random.normal(k_x, (N, Cin, H, W), dtype=jnp.float32)
    weight = jax.random.normal(k_w, (Cout, Cin, 3, 3), dtype=jnp.float32) * 0.1
    gamma = jnp.ones((Cout,), jnp.float32)   # BatchNorm2d default weight init
    beta = jnp.zeros((Cout,), jnp.float32)   # BatchNorm2d default bias init

    fn = jax.jit(conv_bn_relu)
    out = jax.block_until_ready(fn(x, weight, gamma, beta))

    assert out.shape == (N, Cout, H, W)
    assert out.dtype == jnp.float32

    # Tight check vs a reference fed the same bf16-rounded inputs (isolates kernel
    # structure from bf16 input rounding), plus a looser check vs the exact f32
    # module reference (bf16 MXU matmul + bf16 intermediate precision).
    ref_bf16_in = _reference(x.astype(jnp.bfloat16).astype(jnp.float32),
                             weight.astype(jnp.bfloat16).astype(jnp.float32),
                             gamma, beta)
    ref_f32 = _reference(x, weight, gamma, beta)
    assert jnp.allclose(out, ref_bf16_in, rtol=3e-2, atol=3e-2), "mismatch (bf16-matched ref)"
    assert jnp.allclose(out, ref_f32, rtol=1e-1, atol=1e-1), "mismatch (f32 ref)"

    print("KERNEL_OK")
</pallas_src>

<mosaic_0001>
module attributes {stable_mosaic.version = 11 : i64} {
  func.func @_conv3x3_bnstats_kernel(%arg0: i32, %arg1: i32, %arg2: i32, %arg3: memref<1x8x16x4xbf16, #tpu.memory_space<vmem>>, %arg4: memref<1x1x2x16x4xbf16, #tpu.memory_space<vmem>>, %arg5: memref<36x128xbf16, #tpu.memory_space<vmem>>, %arg6: memref<1x128x128xbf16, #tpu.memory_space<vmem>>, %arg7: memref<1x1x1x128xf32, #tpu.memory_space<vmem>>, %arg8: memref<1x1x1x128xf32, #tpu.memory_space<vmem>>) attributes {dimension_semantics = [#tpu.dimension_semantics<parallel>, #tpu.dimension_semantics<parallel>, #tpu.dimension_semantics<parallel>], iteration_bounds = array<i64: 2, 2, 1>, scalar_prefetch = 0 : i64, scratch_operands = 0 : i64, tpu.core_type = #tpu.core_type<tc>, window_params = [{transform_indices = @transform_0, window_bounds = array<i64: 1, 8, 16, 4>}, {transform_indices = @transform_1, window_bounds = array<i64: 1, 1, 2, 16, 4>}, {transform_indices = @transform_2, window_bounds = array<i64: 36, 128>}, {transform_indices = @transform_3, window_bounds = array<i64: 1, 128, 128>}, {transform_indices = @transform_4, window_bounds = array<i64: 1, 1, 1, 128>}, {transform_indices = @transform_5, window_bounds = array<i64: 1, 1, 1, 128>}]} {
    %c0 = arith.constant 0 : index
    %c0_0 = arith.constant 0 : index
    %c0_1 = arith.constant 0 : index
    %c0_2 = arith.constant 0 : index
    %0 = vector.load %arg3[%c0, %c0_0, %c0_1, %c0_2] : memref<1x8x16x4xbf16, #tpu.memory_space<vmem>>, vector<1x8x16x4xbf16>
    %1 = vector.shape_cast %0 : vector<1x8x16x4xbf16> to vector<8x16x4xbf16>
    %c0_3 = arith.constant 0 : index
    %c0_4 = arith.constant 0 : index
    %c0_5 = arith.constant 0 : index
    %c0_6 = arith.constant 0 : index
    %c0_7 = arith.constant 0 : index
    %2 = vector.load %arg4[%c0_3, %c0_4, %c0_5, %c0_6, %c0_7] : memref<1x1x2x16x4xbf16, #tpu.memory_space<vmem>>, vector<1x1x2x16x4xbf16>
    %3 = vector.shape_cast %2 : vector<1x1x2x16x4xbf16> to vector<2x16x4xbf16>
    %4 = vector.extract_strided_slice %3 {offsets = [0, 0, 0], sizes = [1, 16, 4], strides = [1, 1, 1]} : vector<2x16x4xbf16> to vector<1x16x4xbf16>
    %5 = vector.extract_strided_slice %3 {offsets = [1, 0, 0], sizes = [1, 16, 4], strides = [1, 1, 1]} : vector<2x16x4xbf16> to vector<1x16x4xbf16>
    %6 = tpu.concatenate %4, %1, %5 in 0 : vector<1x16x4xbf16>, vector<8x16x4xbf16>, vector<1x16x4xbf16> -> vector<10x16x4xbf16>
    %cst = arith.constant 0.000000e+00 : bf16
    %7 = vector.broadcast %cst : bf16 to vector<10x1x4xbf16>
    %8 = tpu.concatenate %7, %6, %7 in 1 : vector<10x1x4xbf16>, vector<10x16x4xbf16>, vector<10x1x4xbf16> -> vector<10x18x4xbf16>
    %9 = vector.extract_strided_slice %8 {offsets = [0, 0, 0], sizes = [10, 16, 4], strides = [1, 1, 1]} : vector<10x18x4xbf16> to vector<10x16x4xbf16>
    %10 = vector.extract_strided_slice %8 {offsets = [0, 1, 0], sizes = [10, 16, 4], strides = [1, 1, 1]} : vector<10x18x4xbf16> to vector<10x16x4xbf16>
    %11 = vector.extract_strided_slice %8 {offsets = [0, 2, 0], sizes = [10, 16, 4], strides = [1, 1, 1]} : vector<10x18x4xbf16> to vector<10x16x4xbf16>
    %12 = tpu.concatenate %9, %10, %11 in 2 : vector<10x16x4xbf16>, vector<10x16x4xbf16>, vector<10x16x4xbf16> -> vector<10x16x12xbf16>
    %13 = vector.extract_strided_slice %12 {offsets = [0, 0, 0], sizes = [8, 16, 12], strides = [1, 1, 1]} : vector<10x16x12xbf16> to vector<8x16x12xbf16>
    %14 = vector.extract_strided_slice %12 {offsets = [1, 0, 0], sizes = [8, 16, 12], strides = [1, 1, 1]} : vector<10x16x12xbf16> to vector<8x16x12xbf16>
    %15 = vector.extract_strided_slice %12 {offsets = [2, 0, 0], sizes = [8, 16, 12], strides = [1, 1, 1]} : vector<10x16x12xbf16> to vector<8x16x12xbf16>
    %16 = tpu.concatenate %13, %14, %15 in 2 : vector<8x16x12xbf16>, vector<8x16x12xbf16>, vector<8x16x12xbf16> -> vector<8x16x36xbf16>
    %17 = vector.shape_cast %16 : vector<8x16x36xbf16> to vector<128x36xbf16>
    %c0_8 = arith.constant 0 : index
    %c0_9 = arith.constant 0 : index
    %18 = vector.load %arg5[%c0_8, %c0_9] : memref<36x128xbf16, #tpu.memory_space<vmem>>, vector<36x128xbf16>
    %cst_10 = arith.constant dense<0.000000e+00> : vector<128x128xf32>
    %19 = tpu.matmul %17, %18, %cst_10 {dimension_numbers = #tpu.dot_dimension_numbers<[1], [0], [0], [1], [0, 0, 1, 1], [], []>} : vector<128x36xbf16>, vector<36x128xbf16>, vector<128x128xf32> -> vector<128x128xf32>
    %20 = arith.truncf %19 : vector<128x128xf32> to vector<128x128xbf16>
    %21 = vector.shape_cast %20 : vector<128x128xbf16> to vector<1x128x128xbf16>
    %c0_11 = arith.constant 0 : index
    %c0_12 = arith.constant 0 : index
    %c0_13 = arith.constant 0 : index
    %22 = vector.load %arg6[%c0_11, %c0_12, %c0_13] : memref<1x128x128xbf16, #tpu.memory_space<vmem>>, vector<1x128x128xbf16>
    tpu.vector_store %arg6[%c0_11, %c0_12, %c0_13], %21 {strides = array<i32>} : memref<1x128x128xbf16, #tpu.memory_space<vmem>>, vector<1x128x128xbf16>,
    %cst_14 = arith.constant dense<0.000000e+00> : vector<128xf32>
    %23 = vector.multi_reduction <add>, %19, %cst_14 [0] : vector<128x128xf32> to vector<128xf32>
    %24 = vector.shape_cast %23 : vector<128xf32> to vector<1x1x1x128xf32>
    %c0_15 = arith.constant 0 : index
    %c0_16 = arith.constant 0 : index
    %c0_17 = arith.constant 0 : index
    %c0_18 = arith.constant 0 : index
    %25 = vector.load %arg7[%c0_15, %c0_16, %c0_17, %c0_18] : memref<1x1x1x128xf32, #tpu.memory_space<vmem>>, vector<1x1x1x128xf32>
    tpu.vector_store %arg7[%c0_15, %c0_16, %c0_17, %c0_18], %24 {strides = array<i32>} : memref<1x1x1x128xf32, #tpu.memory_space<vmem>>, vector<1x1x1x128xf32>,
    %26 = arith.mulf %19, %19 : vector<128x128xf32>
    %cst_19 = arith.constant dense<0.000000e+00> : vector<128xf32>
    %27 = vector.multi_reduction <add>, %26, %cst_19 [0] : vector<128x128xf32> to vector<128xf32>
    %28 = vector.shape_cast %27 : vector<128xf32> to vector<1x1x1x128xf32>
    %c0_20 = arith.constant 0 : index
    %c0_21 = arith.constant 0 : index
    %c0_22 = arith.constant 0 : index
    %c0_23 = arith.constant 0 : index
    %29 = vector.load %arg8[%c0_20, %c0_21, %c0_22, %c0_23] : memref<1x1x1x128xf32, #tpu.memory_space<vmem>>, vector<1x1x1x128xf32>
    tpu.vector_store %arg8[%c0_20, %c0_21, %c0_22, %c0_23], %28 {strides = array<i32>} : memref<1x1x1x128xf32, #tpu.memory_space<vmem>>, vector<1x1x1x128xf32>,
    return
  }
  func.func @transform_0(%arg0: i32, %arg1: i32, %arg2: i32) -> (i32, i32, i32, i32) {
    %c0_i32 = arith.constant 0 : i32
    %c0_i32_0 = arith.constant 0 : i32
    %c0_i32_1 = arith.constant 0 : i32
    return %arg0, %arg1, %c0_i32, %c0_i32_0 : i32, i32, i32, i32
  }
  func.func @transform_1(%arg0: i32, %arg1: i32, %arg2: i32) -> (i32, i32, i32, i32, i32) {
    %c0_i32 = arith.constant 0 : i32
    %c0_i32_0 = arith.constant 0 : i32
    %c0_i32_1 = arith.constant 0 : i32
    %c0_i32_2 = arith.constant 0 : i32
    return %arg0, %arg1, %c0_i32, %c0_i32_0, %c0_i32_1 : i32, i32, i32, i32, i32
  }
  func.func @transform_2(%arg0: i32, %arg1: i32, %arg2: i32) -> (i32, i32) {
    %c0_i32 = arith.constant 0 : i32
    %c0_i32_0 = arith.constant 0 : i32
    return %c0_i32, %arg2 : i32, i32
  }
  func.func @transform_3(%arg0: i32, %arg1: i32, %arg2: i32) -> (i32, i32, i32) {
    %c0_i32 = arith.constant 0 : i32
    return %arg0, %arg1, %arg2 : i32, i32, i32
  }
  func.func @transform_4(%arg0: i32, %arg1: i32, %arg2: i32) -> (i32, i32, i32, i32) {
    %c0_i32 = arith.constant 0 : i32
    %c0_i32_0 = arith.constant 0 : i32
    return %arg0, %arg1, %c0_i32, %arg2 : i32, i32, i32, i32
  }
  func.func @transform_5(%arg0: i32, %arg1: i32, %arg2: i32) -> (i32, i32, i32, i32) {
    %c0_i32 = arith.constant 0 : i32
    %c0_i32_0 = arith.constant 0 : i32
    return %arg0, %arg1, %c0_i32, %arg2 : i32, i32, i32, i32
  }
}

module attributes {stable_mosaic.version = 11 : i64} {
  func.func @_bn_relu_kernel(%arg0: i32, %arg1: i32, %arg2: i32, %arg3: memref<1x256x128xbf16, #tpu.memory_space<vmem>>, %arg4: memref<1x128xf32, #tpu.memory_space<vmem>>, %arg5: memref<1x128xf32, #tpu.memory_space<vmem>>, %arg6: memref<1x256x128xbf16, #tpu.memory_space<vmem>>) attributes {dimension_semantics = [#tpu.dimension_semantics<parallel>, #tpu.dimension_semantics<parallel>, #tpu.dimension_semantics<parallel>], iteration_bounds = array<i64: 2, 1, 1>, scalar_prefetch = 0 : i64, scratch_operands = 0 : i64, tpu.core_type = #tpu.core_type<tc>, window_params = [{transform_indices = @transform_0, window_bounds = array<i64: 1, 256, 128>}, {transform_indices = @transform_1, window_bounds = array<i64: 1, 128>}, {transform_indices = @transform_2, window_bounds = array<i64: 1, 128>}, {transform_indices = @transform_3, window_bounds = array<i64: 1, 256, 128>}]} {
    %c0 = arith.constant 0 : index
    %c0_0 = arith.constant 0 : index
    %c0_1 = arith.constant 0 : index
    %0 = vector.load %arg3[%c0, %c0_0, %c0_1] : memref<1x256x128xbf16, #tpu.memory_space<vmem>>, vector<1x256x128xbf16>
    %1 = arith.extf %0 : vector<1x256x128xbf16> to vector<1x256x128xf32>
    %c0_2 = arith.constant 0 : index
    %c0_3 = arith.constant 0 : index
    %2 = vector.load %arg4[%c0_2, %c0_3] : memref<1x128xf32, #tpu.memory_space<vmem>>, vector<1x128xf32>
    %3 = vector.shape_cast %2 : vector<1x128xf32> to vector<1x1x128xf32>
    %c0_4 = arith.constant 0 : index
    %c0_5 = arith.constant 0 : index
    %4 = vector.load %arg5[%c0_4, %c0_5] : memref<1x128xf32, #tpu.memory_space<vmem>>, vector<1x128xf32>
    %5 = vector.shape_cast %4 : vector<1x128xf32> to vector<1x1x128xf32>
    %6 = vector.broadcast %3 : vector<1x1x128xf32> to vector<1x256x128xf32>
    %7 = arith.mulf %1, %6 : vector<1x256x128xf32>
    %8 = vector.broadcast %5 : vector<1x1x128xf32> to vector<1x256x128xf32>
    %9 = arith.addf %7, %8 : vector<1x256x128xf32>
    %cst = arith.constant 0.000000e+00 : f32
    %10 = vector.broadcast %cst : f32 to vector<1x256x128xf32>
    %11 = arith.maximumf %9, %10 : vector<1x256x128xf32>
    %12 = arith.truncf %11 : vector<1x256x128xf32> to vector<1x256x128xbf16>
    %c0_6 = arith.constant 0 : index
    %c0_7 = arith.constant 0 : index
    %c0_8 = arith.constant 0 : index
    %13 = vector.load %arg6[%c0_6, %c0_7, %c0_8] : memref<1x256x128xbf16, #tpu.memory_space<vmem>>, vector<1x256x128xbf16>
    tpu.vector_store %arg6[%c0_6, %c0_7, %c0_8], %12 {strides = array<i32>} : memref<1x256x128xbf16, #tpu.memory_space<vmem>>, vector<1x256x128xbf16>,
    return
  }
  func.func @transform_0(%arg0: i32, %arg1: i32, %arg2: i32) -> (i32, i32, i32) {
    %c0_i32 = arith.constant 0 : i32
    return %arg0, %arg1, %arg2 : i32, i32, i32
  }
  func.func @transform_1(%arg0: i32, %arg1: i32, %arg2: i32) -> (i32, i32) {
    %c0_i32 = arith.constant 0 : i32
    %c0_i32_0 = arith.constant 0 : i32
    return %c0_i32, %arg2 : i32, i32
  }
  func.func @transform_2(%arg0: i32, %arg1: i32, %arg2: i32) -> (i32, i32) {
    %c0_i32 = arith.constant 0 : i32
    %c0_i32_0 = arith.constant 0 : i32
    return %c0_i32, %arg2 : i32, i32
  }
  func.func @transform_3(%arg0: i32, %arg1: i32, %arg2: i32) -> (i32, i32, i32) {
    %c0_i32 = arith.constant 0 : i32
    return %arg0, %arg1, %arg2 : i32, i32, i32
  }
}

</mosaic_0001>

<bundles_post_ra>
// kernel: conv_bn_relu.3
= control target key start
LH: loop header
LB: loop body
LE: loop exit
PB: predicated region body
PF: predicated region fallthrough
CT: control target
= control target key end

     0   :  { %s1048_s12 = smov 0   ;;  %s1050_s13 = smov 0   ;;  %s1206_s0 = inlined_call_operand.vmem [shape: bf16[2,256,128], index: 0, kind: input, shape index: {}, may-alias: {0,3}]   ;;  %s1207_s1 = inlined_call_operand.vmem [shape: f32[1,128], index: 1, kind: input, shape index: {}]   ;;  %s1208_s2 = inlined_call_operand.vmem [shape: f32[1,128], index: 2, kind: input, shape index: {}]   ;;  %s1209_s3 = inlined_call_operand.vmem [shape: bf16[2,256,128], index: 3, kind: output, shape index: {}, may-alias: {0,3}]  }
   0x1   :  { %s1052_s14 = smov 0  }
   0x2 LB: > { %s32_s15 = sadd.s32 1, %s1022_s13  ;;  %p731_p0 = scmp.ge.s32.totalorder %s1026_s14, 1  ;;  %s1026_s14 = sphi %s1052_s14, %s13_s14   ;;  %s1022_s13 = sphi %s1050_s13, %s1211_s13   ;;  %s1018_s12 = sphi %s1048_s12, %s1210_s12  }
   0x3   : > { %p34_p1 = scmp.ge.s32.totalorder %s32_s15, 2  ;;  %p188_p2 = scmp.lt.s32.totalorder %s1026_s14, 3 }
   0x5   : > { %s1213_s15 = smov (%p34_p1, %s32_s15), 0  ;;  %p189_p3 = pnand %p731_p0, %p188_p2 }
   0x6   : > { %p233_p4 = scmp.lt.s32.totalorder (!%p189_p3), %s1018_s12, 1  ;;  %v736_v40 = vld [vmem:[%s1207_s1] ss:$0 sm:$0xff] (!%p189_p3) }
   0x7   : > { %192 = sbr.rel (%p189_p3) target bundleno = 58 (0x3a), region = 32 }
   0xe   : > { %s1215_s12 = smov (!%p233_p4, %s1018_s12), 1 }
   0xf   : > { %s772_s16 = sshll.u32 %s1215_s12, 7 }
  0x10   : > { %s1074_s19 = scalar_lea.vmem %s1206_s0, %s772_s16  ;;  %s1141_s26 = scalar_lea.vmem %s1209_s3, %s772_s16 }
  0x11   : > { %v807_v0 = vld [vmem:[%s1074_s19] sm:$0xff]   ;;  %v950_v1 = vld [vmem:[%s1074_s19 + $0x8] sm:$0xff]   ;;  %v951_v2 = vld [vmem:[%s1074_s19 + $0x10] sm:$0xff]  }
  0x12   : > { %v808_v3 = vunpack.c.l.bf16 %v807_v0  ;;  %v809_v4 = vunpack.c.h.bf16 %v807_v0  ;;  %v812_v5 = vunpack.c.l.bf16 %v950_v1  ;;  %v813_v6 = vunpack.c.h.bf16 %v950_v1  ;;  %v952_v7 = vld [vmem:[%s1074_s19 + $0x18] sm:$0xff]   ;;  %v953_v8 = vld [vmem:[%s1074_s19 + $0x20] sm:$0xff]   ;;  %v954_v9 = vld [vmem:[%s1074_s19 + $0x28] sm:$0xff]  }
  0x13   : > { %v816_v10 = vunpack.c.l.bf16 %v951_v2  ;;  %v817_v11 = vunpack.c.h.bf16 %v951_v2  ;;  %v820_v12 = vunpack.c.l.bf16 %v952_v7  ;;  %v821_v13 = vunpack.c.h.bf16 %v952_v7  ;;  %v955_v14 = vld [vmem:[%s1074_s19 + $0x30] sm:$0xff]   ;;  %v956_v15 = vld [vmem:[%s1074_s19 + $0x38] sm:$0xff]   ;;  %v957_v16 = vld [vmem:[%s1074_s19 + $0x40] sm:$0xff]  }
  0x14   : > { %v824_v17 = vunpack.c.l.bf16 %v953_v8  ;;  %v825_v18 = vunpack.c.h.bf16 %v953_v8  ;;  %v828_v19 = vunpack.c.l.bf16 %v954_v9  ;;  %v829_v20 = vunpack.c.h.bf16 %v954_v9  ;;  %v958_v21 = vld [vmem:[%s1074_s19 + $0x48] sm:$0xff]   ;;  %v959_v22 = vld [vmem:[%s1074_s19 + $0x50] sm:$0xff]   ;;  %v960_v23 = vld [vmem:[%s1074_s19 + $0x58] sm:$0xff]  }
  0x15   : > { %v832_v24 = vunpack.c.l.bf16 %v955_v14  ;;  %v833_v25 = vunpack.c.h.bf16 %v955_v14  ;;  %v836_v26 = vunpack.c.l.bf16 %v956_v15  ;;  %v837_v27 = vunpack.c.h.bf16 %v956_v15  ;;  %v961_v28 = vld [vmem:[%s1074_s19 + $0x60] sm:$0xff]   ;;  %v962_v29 = vld [vmem:[%s1074_s19 + $0x68] sm:$0xff]   ;;  %v963_v34 = vld [vmem:[%s1074_s19 + $0x70] sm:$0xff]  }
  0x16   : > { %v840_v30 = vunpack.c.l.bf16 %v957_v16  ;;  %v841_v31 = vunpack.c.h.bf16 %v957_v16  ;;  %v844_v32 = vunpack.c.l.bf16 %v958_v21  ;;  %v845_v33 = vunpack.c.h.bf16 %v958_v21  ;;  %v964_v35 = vld [vmem:[%s1074_s19 + $0x78] sm:$0xff]  }
  0x17   : > { %v848_v36 = vunpack.c.l.bf16 %v959_v22  ;;  %v849_v37 = vunpack.c.h.bf16 %v959_v22  ;;  %v852_v38 = vunpack.c.l.bf16 %v960_v23  ;;  %v853_v39 = vunpack.c.h.bf16 %v960_v23 }
  0x18   : > { %v856_v41 = vunpack.c.l.bf16 %v961_v28  ;;  %v857_v42 = vunpack.c.h.bf16 %v961_v28  ;;  %v860_v43 = vunpack.c.l.bf16 %v962_v29  ;;  %v861_v44 = vunpack.c.h.bf16 %v962_v29 }
  0x19   : > { %v864_v45 = vunpack.c.l.bf16 %v963_v34  ;;  %v865_v46 = vunpack.c.h.bf16 %v963_v34  ;;  %v868_v47 = vunpack.c.l.bf16 %v964_v35  ;;  %v869_v48 = vunpack.c.h.bf16 %v964_v35 }
  0x1a   : > { %v336_v49 = vmul.f32 %v808_v3, %v736_v40  ;;  %v337_v50 = vmul.f32 %v809_v4, %v736_v40  ;;  %v338_v51 = vmul.f32 %v812_v5, %v736_v40  ;;  %v339_v52 = vmul.f32 %v813_v6, %v736_v40  ;;  %v1102_v4 = vld [vmem:[%s1208_s2] ss:$0 sm:$0xff] }
  0x1b   : > { %v340_v53 = vmul.f32 %v816_v10, %v736_v40  ;;  %v341_v54 = vmul.f32 %v817_v11, %v736_v40  ;;  %v342_v55 = vmul.f32 %v820_v12, %v736_v40  ;;  %v343_v56 = vmul.f32 %v821_v13, %v736_v40 }
  0x1c   : > { %v344_v57 = vmul.f32 %v824_v17, %v736_v40  ;;  %v345_v58 = vmul.f32 %v825_v18, %v736_v40  ;;  %v346_v59 = vmul.f32 %v828_v19, %v736_v40  ;;  %v347_v60 = vmul.f32 %v829_v20, %v736_v40 }
  0x1d   : > { %v348_v61 = vmul.f32 %v832_v24, %v736_v40  ;;  %v349_v62 = vmul.f32 %v833_v25, %v736_v40  ;;  %v350_v63 = vmul.f32 %v836_v26, %v736_v40  ;;  %v351_v0 = vmul.f32 %v837_v27, %v736_v40 }
  0x1e   : > { %v352_v1 = vmul.f32 %v840_v30, %v736_v40  ;;  %v353_v2 = vmul.f32 %v841_v31, %v736_v40  ;;  %v1095_v7 = vmul.f32 %v844_v32, %v736_v40  ;;  %v1097_v3 = vmul.f32 %v845_v33, %v736_v40 }
  0x1f   : > { %v1104_v5 = vmul.f32 %v848_v36, %v736_v40  ;;  %v1106_v6 = vmul.f32 %v849_v37, %v736_v40  ;;  %v1108_v8 = vmul.f32 %v852_v38, %v736_v40  ;;  %v1110_v9 = vmul.f32 %v853_v39, %v736_v40 }
  0x20   : > { %v1112_v10 = vmul.f32 %v856_v41, %v736_v40  ;;  %v1114_v11 = vmul.f32 %v857_v42, %v736_v40  ;;  %v1116_v12 = vmul.f32 %v860_v43, %v736_v40  ;;  %v1118_v13 = vmul.f32 %v861_v44, %v736_v40 }
  0x21   : > { %v1120_v14 = vmul.f32 %v864_v45, %v736_v40  ;;  %v1122_v15 = vmul.f32 %v865_v46, %v736_v40  ;;  %v1124_v16 = vmul.f32 %v868_v47, %v736_v40  ;;  %v1126_v17 = vmul.f32 %v869_v48, %v736_v40 }
  0x22   : > { %v374_v18 = vadd.f32 %v1102_v4, %v336_v49  ;;  %v375_v19 = vadd.f32 %v1102_v4, %v337_v50  ;;  %v376_v20 = vadd.f32 %v1102_v4, %v338_v51  ;;  %v377_v21 = vadd.f32 %v1102_v4, %v339_v52 }
  0x23   : > { %v378_v22 = vadd.f32 %v1102_v4, %v340_v53  ;;  %v379_v23 = vadd.f32 %v1102_v4, %v341_v54  ;;  %v380_v24 = vadd.f32 %v1102_v4, %v342_v55  ;;  %v381_v25 = vadd.f32 %v1102_v4, %v343_v56 }
  0x24   : > { %v406_v26 = vmax.f32 %v374_v18, 0.0  ;;  %v407_v27 = vmax.f32 %v375_v19, 0.0  ;;  %v408_v28 = vmax.f32 %v376_v20, 0.0  ;;  %v409_v29 = vmax.f32 %v377_v21, 0.0 }
  0x25   : > { %v410_v30 = vmax.f32 %v378_v22, 0.0  ;;  %v411_v31 = vmax.f32 %v379_v23, 0.0  ;;  %v412_v32 = vmax.f32 %v380_v24, 0.0  ;;  %v413_v33 = vmax.f32 %v381_v25, 0.0 }
  0x26   : > { %v873_v34 = vpack.c.bf16 %v407_v27, %v406_v26  ;;  %v878_v35 = vpack.c.bf16 %v409_v29, %v408_v28  ;;  %v382_v36 = vadd.f32 %v1102_v4, %v344_v57  ;;  %v383_v37 = vadd.f32 %v1102_v4, %v345_v58 }
  0x27   : > { %v883_v38 = vpack.c.bf16 %v411_v31, %v410_v30  ;;  %v888_v39 = vpack.c.bf16 %v413_v33, %v412_v32  ;;  %v384_v40 = vadd.f32 %v1102_v4, %v346_v59  ;;  %v385_v41 = vadd.f32 %v1102_v4, %v347_v60 }
  0x28   : > { %874 = vst [vmem:[%s1141_s26] sm:$0xff] %v873_v34   ;;  %965 = vst [vmem:[%s1141_s26 + $0x8] sm:$0xff] %v878_v35   ;;  %v414_v42 = vmax.f32 %v382_v36, 0.0  ;;  %v415_v43 = vmax.f32 %v383_v37, 0.0  ;;  %v386_v44 = vadd.f32 %v1102_v4, %v348_v61  ;;  %v387_v45 = vadd.f32 %v1102_v4, %v349_v62 }
  0x29   : > { %966 = vst [vmem:[%s1141_s26 + $0x10] sm:$0xff] %v883_v38   ;;  %967 = vst [vmem:[%s1141_s26 + $0x18] sm:$0xff] %v888_v39   ;;  %v416_v46 = vmax.f32 %v384_v40, 0.0  ;;  %v417_v47 = vmax.f32 %v385_v41, 0.0  ;;  %v388_v48 = vadd.f32 %v1102_v4, %v350_v63  ;;  %v389_v49 = vadd.f32 %v1102_v4, %v351_v0 }
  0x2a   : > { %v893_v50 = vpack.c.bf16 %v415_v43, %v414_v42  ;;  %v418_v51 = vmax.f32 %v386_v44, 0.0  ;;  %v419_v52 = vmax.f32 %v387_v45, 0.0  ;;  %v390_v53 = vadd.f32 %v1102_v4, %v352_v1 }
  0x2b   : > { %v898_v54 = vpack.c.bf16 %v417_v47, %v416_v46  ;;  %v420_v55 = vmax.f32 %v388_v48, 0.0  ;;  %v421_v56 = vmax.f32 %v389_v49, 0.0  ;;  %v391_v57 = vadd.f32 %v1102_v4, %v353_v2 }
  0x2c   : > { %968 = vst [vmem:[%s1141_s26 + $0x20] sm:$0xff] %v893_v50   ;;  %v903_v58 = vpack.c.bf16 %v419_v52, %v418_v51  ;;  %v422_v59 = vmax.f32 %v390_v53, 0.0  ;;  %v392_v60 = vadd.f32 %v1102_v4, %v1095_v7  ;;  %v393_v61 = vadd.f32 %v1102_v4, %v1097_v3 }
  0x2d   : > { %969 = vst [vmem:[%s1141_s26 + $0x28] sm:$0xff] %v898_v54   ;;  %v908_v62 = vpack.c.bf16 %v421_v56, %v420_v55  ;;  %v423_v63 = vmax.f32 %v391_v57, 0.0  ;;  %v394_v0 = vadd.f32 %v1102_v4, %v1104_v5  ;;  %v395_v1 = vadd.f32 %v1102_v4, %v1106_v6 }
  0x2e   : > { %970 = vst [vmem:[%s1141_s26 + $0x30] sm:$0xff] %v903_v58   ;;  %v424_v2 = vmax.f32 %v392_v60, 0.0  ;;  %v425_v18 = vmax.f32 %v393_v61, 0.0  ;;  %v396_v19 = vadd.f32 %v1102_v4, %v1108_v8  ;;  %v397_v7 = vadd.f32 %v1102_v4, %v1110_v9 }
  0x2f   : > { %971 = vst [vmem:[%s1141_s26 + $0x38] sm:$0xff] %v908_v62   ;;  %v913_v3 = vpack.c.bf16 %v423_v63, %v422_v59  ;;  %v426_v20 = vmax.f32 %v394_v0, 0.0  ;;  %v427_v21 = vmax.f32 %v395_v1, 0.0  ;;  %v398_v5 = vadd.f32 %v1102_v4, %v1112_v10 }
  0x30   : > { %v918_v22 = vpack.c.bf16 %v425_v18, %v424_v2  ;;  %v428_v6 = vmax.f32 %v396_v19, 0.0  ;;  %v429_v23 = vmax.f32 %v397_v7, 0.0  ;;  %v399_v24 = vadd.f32 %v1102_v4, %v1114_v11 }
  0x31   : > { %972 = vst [vmem:[%s1141_s26 + $0x40] sm:$0xff] %v913_v3   ;;  %v923_v8 = vpack.c.bf16 %v427_v21, %v426_v20  ;;  %v430_v25 = vmax.f32 %v398_v5, 0.0  ;;  %v400_v9 = vadd.f32 %v1102_v4, %v1116_v12  ;;  %v401_v26 = vadd.f32 %v1102_v4, %v1118_v13 }
  0x32   : > { %973 = vst [vmem:[%s1141_s26 + $0x48] sm:$0xff] %v918_v22   ;;  %v928_v27 = vpack.c.bf16 %v429_v23, %v428_v6  ;;  %v431_v10 = vmax.f32 %v399_v24, 0.0  ;;  %v402_v28 = vadd.f32 %v1102_v4, %v1120_v14  ;;  %v403_v11 = vadd.f32 %v1102_v4, %v1122_v15 }
  0x33   : > { %974 = vst [vmem:[%s1141_s26 + $0x50] sm:$0xff] %v923_v8   ;;  %v432_v29 = vmax.f32 %v400_v9, 0.0  ;;  %v433_v30 = vmax.f32 %v401_v26, 0.0  ;;  %v404_v12 = vadd.f32 %v1102_v4, %v1124_v16  ;;  %v405_v13 = vadd.f32 %v1102_v4, %v1126_v17 }
  0x34   : > { %975 = vst [vmem:[%s1141_s26 + $0x58] sm:$0xff] %v928_v27   ;;  %v933_v31 = vpack.c.bf16 %v431_v10, %v430_v25  ;;  %v434_v32 = vmax.f32 %v402_v28, 0.0  ;;  %v435_v33 = vmax.f32 %v403_v11, 0.0 }
  0x35   : > { %v938_v14 = vpack.c.bf16 %v433_v30, %v432_v29  ;;  %v436_v34 = vmax.f32 %v404_v12, 0.0  ;;  %v437_v35 = vmax.f32 %v405_v13, 0.0 }
  0x36   : > { %976 = vst [vmem:[%s1141_s26 + $0x60] sm:$0xff] %v933_v31   ;;  %v943_v15 = vpack.c.bf16 %v435_v33, %v434_v32 }
  0x37   : > { %977 = vst [vmem:[%s1141_s26 + $0x68] sm:$0xff] %v938_v14   ;;  %v948_v36 = vpack.c.bf16 %v437_v35, %v436_v34 }
  0x38   : > { %978 = vst [vmem:[%s1141_s26 + $0x70] sm:$0xff] %v943_v15  }
  0x39   : > { %979 = vst [vmem:[%s1141_s26 + $0x78] sm:$0xff] %v948_v36  }
  0x3a PF: > { %s13_s14 = sadd.s32 1, %s1026_s14   ;;  %s1210_s12 = smov %s1022_s13 }
  0x3b   : > { %p10_p5 = scmp.ge.s32.totalorder %s13_s14, 4   ;;  %s1211_s13 = smov %s1213_s15 }
  0x3d   :  { %12 = sbr.rel (!%p10_p5) target bundleno = 2 (0x2), region = 68 }

// kernel: conv_bn_relu.2
= control target key start
LH: loop header
LB: loop body
LE: loop exit
PB: predicated region body
PF: predicated region fallthrough
CT: control target
= control target key end

     0   :  { %s1713_s18 = smov 0   ;;  %s1715_s19 = smov 0   ;;  %s2042_s0 = inlined_call_operand.vmem [shape: bf16[2,16,16,4], index: 0, kind: input, shape index: {}]   ;;  %s2043_s1 = inlined_call_operand.vmem [shape: bf16[2,2,2,16,4], index: 1, kind: input, shape index: {}]   ;;  %s2044_s2 = inlined_call_operand.vmem [shape: bf16[36,128], index: 2, kind: input, shape index: {}]   ;;  %s2045_s3 = inlined_call_operand.vmem [shape: bf16[2,256,128], index: 3, kind: output, shape index: {0}]   ;;  %s2046_s4 = inlined_call_operand.vmem [shape: f32[2,2,1,128], index: 4, kind: output, shape index: {1}]   ;;  %s2047_s5 = inlined_call_operand.vmem [shape: f32[2,2,1,128], index: 5, kind: output, shape index: {2}]  }
   0x1   :  { %s1717_s20 = smov 0   ;;  %s1719_s21 = smov 0  }
   0x2   :  { %s1721_s22 = smov 0  }
   0x3 LB: > { %s31_s23 = sadd.s32 1, %s1669_s20  ;;  %s35_s24 = sadd.s32 1, %s1673_s21  ;;  %s1677_s22 = sphi %s1721_s22, %s16_s22   ;;  %s1673_s21 = sphi %s1719_s21, %s2053_s21   ;;  %s1669_s20 = sphi %s1717_s20, %s2052_s20   ;;  %s1665_s19 = sphi %s1715_s19, %s2051_s19   ;;  %s1661_s18 = sphi %s1713_s18, %s2050_s18  }
   0x4   : > { %p33_p0 = scmp.ge.s32.totalorder %s31_s23, 2  ;;  %p1426_p1 = scmp.ge.s32.totalorder %s1677_s22, 1 }
   0x5   : > { %p256_p2 = scmp.lt.s32.totalorder %s1677_s22, 5 }
   0x6   : > { %s2055_s23 = smov (%p33_p0, %s31_s23), 0  ;;  %s2057_s24 = smov (!%p33_p0, %s35_s24), %s1673_s21 }
   0x7   : > { %p257_p3 = pnand %p1426_p1, %p256_p2  ;;  %p37_p4 = scmp.ge.s32.totalorder %s2057_s24, 2 }
   0x8   : > { %s1427_s25 = sshll.u32 (!%p257_p3), %s1661_s18, 3  ;;  %p330_p5 = scmp.lt.s32.totalorder (!%p257_p3), %s1665_s19, 1  ;;  %vm547_vm0 = vcmask (!%p257_p3), 1040384   ;;  %vm548_vm1 = vsmask.f32 (!%p257_p3), 256  ;;  %vm731_vm2 = vcmask (!%p257_p3), 1046528  }
   0x9   : > { %s2059_s24 = smov (%p37_p4, %s2057_s24), 0  ;;  %260 = sbr.rel (%p257_p3) target bundleno = 540 (0x21c), region = 32 }
   0xa   : > { %p332_p6 = scmp.lt.s32.totalorder (!%p257_p3), %s1427_s25, 15  ;;  %p342_p7 = scmp.lt.s32.totalorder (!%p257_p3), %s1661_s18, 1  ;;  %vm570_vm3 = vsmask.f32 (!%p257_p3), 7424  ;;  %vm1765_vm4 = vmand (!%p257_p3), %vm547_vm0, %vm548_vm1  ;;  %vm936_vm5 = vcmask (!%p257_p3), 1041408   ;;  %vm782_vm6 = vcmask (!%p257_p3), 31744  }
   0xb   : > { %s1679_s11 = smov (!%p257_p3), 8   ;;  %s1680_s17 = smov (!%p257_p3), 4   ;;  %vm803_vm7 = vcmask (!%p257_p3), 64512   ;;  %vm865_vm8 = vcmask (!%p257_p3), 97280   ;;  %vm882_vm9 = vcmask (!%p257_p3), 195584   ;;  %vm919_vm10 = vcmask (!%p257_p3), 293888  }
  0x10   : > { %s2061_s19 = smov (!%p330_p5, %s1665_s19), 1  ;;  %s2063_s25 = smov (!%p332_p6, %s1427_s25), 15 }
  0x11   : > { %s1429_s26 = sshll.u32 %s2061_s19, 5  ;;  %s1428_s27 = sshll.u32 %s2063_s25, 1 }
  0x12   : > { %s336_s28 = sadd.s32 %s1429_s26, %s1428_s27  ;;  %s1432_s8 = sshll.u32 %s2061_s19, 3 }
  0x13   : > { %s1430_s29 = sshll.u32 %s336_s28, 2 }
  0x14   : > { %s1754_s7 = scalar_lea.vmem %s2042_s0, %s1430_s29 }
  0x15   : > { %v1626_v0 = vld [vmem:[%s1754_s7] sm:$0xff]   ;;  %v1627_v1 = vld [vmem:[%s1754_s7 + $0x8] sm:$0xff]   ;;  %v1628_v6 = vld [vmem:[%s1754_s7 + $0x10] sm:$0xff]   ;;  %s1777_s9 = scalar_select %p342_p7, %s1661_s18, 1 }
  0x16   : > { %v465_v2 = vshrl.u32 %v1626_v0, 16  ;;  %v468_v3 = vshll.u32 %v1626_v0, 16  ;;  %v472_v4 = vshrl.u32 %v1627_v1, 16  ;;  %v475_v5 = vshll.u32 %v1627_v1, 16  ;;  %v1629_v7 = vld [vmem:[%s1754_s7 + $0x18] sm:$0xff]   ;;  %v1762_v9 = vld [vmem:[%s1754_s7 + $0x20] sm:$0xff]  }
  0x17   : > { %v479_v12 = vshrl.u32 %v1628_v6, 16  ;;  %v482_v13 = vshll.u32 %v1628_v6, 16  ;;  %v486_v16 = vshrl.u32 %v1629_v7, 16  ;;  %v489_v17 = vshll.u32 %v1629_v7, 16  ;;  %s1431_s10 = sshll.u32 %s1777_s9, 2 }
  0x18   : > { %v467_v8 = vrot.slane %v465_v2, 7  ;;  %v474_v11 = vrot.slane %v472_v4, 7  ;;  %v493_v25 = vshrl.u32 %v1762_v9, 16  ;;  %s346_s12 = sadd.s32 %s1432_s8, %s1431_s10  ;;  %v496_v57 = vshll.u32 %v1762_v9, 16  ;;  %v1631_v2 = vld [vmem:[%s1754_s7 + $0x28] sm:$0xff]   ;;  %s1682_s8 = smov 24  }
  0x19   : > { %v481_v24 = vrot.slane %v479_v12, 7  ;;  %s1433_s13 = sshll.u32 %s346_s12, 2  ;;  %v488_v49 = vrot.slane %v486_v16, 7  ;;  %s1434_s10 = sshll.u32 %s1661_s18, 4 }
  0x1a   : > { %v470_v14 = vor.u32 %v468_v3, %v467_v8  ;;  %v561_v15 = vsel %vm1765_vm4, %v467_v8, 0  ;;  %v477_v20 = vor.u32 %v475_v5, %v474_v11  ;;  %v562_v21 = vsel %vm1765_vm4, %v474_v11, 0  ;;  %s1811_s16 = scalar_lea.vmem %s2043_s1, %s1433_s13  ;;  %v1632_v3 = vld [vmem:[%s1754_s7 + $0x30] sm:$0xff]   ;;  %p356_p8 = scmp.lt.s32.totalorder %s1434_s10, 31 }
  0x1b   : > { %v591_v18 = vshll.u32 %v561_v15, 16  ;;  %v736_v19 = vrot.slane %v561_v15, 1  ;;  %v603_v23 = vshll.u32 %v562_v21, 16  ;;  %v739_v29 = vrot.slane %v562_v21, 1  ;;  %s1437_s18 = sshll.u32 %s2061_s19, 1 }
  0x1c   : > { %v1781_v22 = vsel %vm1765_vm4, 0, %v470_v14  ;;  %v1789_v31 = vsel %vm1765_vm4, 0, %v477_v20  ;;  %v484_v32 = vor.u32 %v482_v13, %v481_v24  ;;  %v563_v33 = vsel %vm1765_vm4, %v481_v24, 0  ;;  %v1633_v13 = vld [vmem:[%s1754_s7 + $0x38] sm:$0xff]   ;;  %s1681_s7 = smov 12   ;;  %s2065_s10 = smov (!%p356_p8, %s1434_s10), 31 }
  0x1d   : > { %v584_v26 = vshrl.u32 %v1781_v22, 16  ;;  %v586_v27 = vshll.u32 %v1781_v22, 16  ;;  %v735_v28 = vrot.slane %v1781_v22, 1  ;;  %v593_v30 = vrot.slane %v591_v18, 1 }
  0x1e   : > { %v596_v36 = vshrl.u32 %v1789_v31, 16  ;;  %v598_v37 = vshll.u32 %v1789_v31, 16  ;;  %v605_v38 = vrot.slane %v603_v23, 1  ;;  %v1800_v39 = vsel %vm1765_vm4, 0, %v484_v32 }
  0x1f   : > { %v588_v34 = vrot.slane %v586_v27, 1  ;;  %v737_v35 = vsel %vm731_vm2, %v735_v28, %v736_v19  ;;  %v615_v40 = vshll.u32 %v563_v33, 16  ;;  %v738_v41 = vrot.slane %v1789_v31, 1 }
  0x20   : > { %764 = vrot.lane.b32.xlu1 %v737_v35, %s1679_s11  ;;  %v600_v43 = vrot.slane %v598_v37, 1  ;;  %v608_v44 = vshrl.u32 %v1800_v39, 16  ;;  %v610_v45 = vshll.u32 %v1800_v39, 16  ;;  %v741_v47 = vrot.slane %v1800_v39, 1 }
  0x21   : > { %v589_v42 = vor.u32 %v588_v34, %v584_v26  ;;  %v617_v46 = vrot.slane %v615_v40, 1  ;;  %v742_v48 = vrot.slane %v563_v33, 1  ;;  %v495_v53 = vrot.slane %v493_v25, 7  ;;  %v1634_v26 = vld [vmem:[%s1811_s16 + $0x8] sm:$0xff]  }
  0x22   : > { %v601_v51 = vor.u32 %v600_v43, %v596_v36  ;;  %v612_v52 = vrot.slane %v610_v45, 1  ;;  %v740_v54 = vsel %vm731_vm2, %v738_v41, %v739_v29  ;;  %v491_v55 = vor.u32 %v489_v17, %v488_v49 }
  0x23   : > { %v594_v50 = vsel %vm570_vm3, %v589_v42, %v593_v30  ;;  %v564_v56 = vsel %vm1765_vm4, %v488_v49, 0  ;;  %v565_v61 = vsel %vm1765_vm4, %v495_v53, 0  ;;  %v743_v62 = vsel %vm731_vm2, %v741_v47, %v742_v48 }
  0x24   : > { %693 = vrot.lane.b32.xlu0 %v594_v50, %s1680_s17  ;;  %v606_v58 = vsel %vm570_vm3, %v601_v51, %v605_v38  ;;  %v613_v59 = vor.u32 %v612_v52, %v608_v44  ;;  %v627_v60 = vshll.u32 %v564_v56, 16  ;;  %v1825_v63 = vsel %vm1765_vm4, 0, %v491_v55 }
  0x25   : > { %v498_v0 = vor.u32 %v496_v57, %v495_v53  ;;  %v639_v1 = vshll.u32 %v565_v61, 16  ;;  %v620_v5 = vshrl.u32 %v1825_v63, 16  ;;  %v622_v6 = vshll.u32 %v1825_v63, 16 }
  0x26   : > { %v618_v4 = vsel %vm570_vm3, %v613_v59, %v617_v46  ;;  %v745_v7 = vrot.slane %v564_v56, 1  ;;  %v629_v8 = vrot.slane %v627_v60, 1  ;;  %v744_v11 = vrot.slane %v1825_v63, 1 }
  0x27   : > { %697 = vrot.lane.b32.xlu1 %v618_v4, %s1680_s17  ;;  %v1836_v9 = vsel %vm1765_vm4, 0, %v498_v0  ;;  %v748_v12 = vrot.slane %v565_v61, 1  ;;  %v624_v14 = vrot.slane %v622_v6, 1  ;;  %v500_v18 = vshrl.u32 %v1631_v2, 16 }
  0x28   : > { %695 = vrot.lane.b32.xlu0 %v606_v58, %s1680_s17  ;;  %v632_v15 = vshrl.u32 %v1836_v9, 16  ;;  %v634_v16 = vshll.u32 %v1836_v9, 16  ;;  %v747_v17 = vrot.slane %v1836_v9, 1  ;;  %v503_v19 = vshll.u32 %v1631_v2, 16 }
  0x29   : > { %v507_v20 = vshrl.u32 %v1632_v3, 16  ;;  %v625_v21 = vor.u32 %v624_v14, %v620_v5  ;;  %v641_v24 = vrot.slane %v639_v1, 1  ;;  %v510_v25 = vshll.u32 %v1632_v3, 16 }
  0x2a   : > { %v636_v23 = vrot.slane %v634_v16, 1  ;;  %v746_v27 = vsel %vm731_vm2, %v744_v11, %v745_v7  ;;  %v502_v28 = vrot.slane %v500_v18, 7  ;;  %v514_v30 = vshrl.u32 %v1633_v13, 16  ;;  %v1635_v11 = vld [vmem:[%s1811_s16] sm:$0xff]  }
  0x2b   : > { %768 = vrot.lane.b32.xlu1 %v743_v62, %s1679_s11  ;;  %v509_v29 = vrot.slane %v507_v20, 7  ;;  %v630_v32 = vsel %vm570_vm3, %v625_v21, %v629_v8  ;;  %v749_v34 = vsel %vm731_vm2, %v747_v17, %v748_v12  ;;  %v517_v35 = vshll.u32 %v1633_v13, 16 }
  0x2c   : > { %766 = vrot.lane.b32.xlu0 %v740_v54, %s1679_s11  ;;  %v637_v33 = vor.u32 %v636_v23, %v632_v15  ;;  %v505_v36 = vor.u32 %v503_v19, %v502_v28  ;;  %v566_v37 = vsel %vm1765_vm4, %v502_v28, 0  ;;  %v521_v44 = vshrl.u32 %v1634_v26, 16 }
  0x2d   : > { %v512_v38 = vor.u32 %v510_v25, %v509_v29  ;;  %v567_v40 = vsel %vm1765_vm4, %v509_v29, 0  ;;  %v651_v42 = vshll.u32 %v566_v37, 16  ;;  %v516_v47 = vrot.slane %v514_v30, 7 }
  0x2e   : > { %v642_v41 = vsel %vm570_vm3, %v637_v33, %v641_v24  ;;  %v663_v43 = vshll.u32 %v567_v40, 16  ;;  %v1858_v45 = vsel %vm1765_vm4, 0, %v505_v36  ;;  %v524_v48 = vshll.u32 %v1634_v26, 16 }
  0x2f   : > { %701 = vrot.lane.b32.xlu1 %v642_v41, %s1680_s17  ;;  %v1862_v46 = vsel %vm1765_vm4, 0, %v512_v38  ;;  %v644_v49 = vshrl.u32 %v1858_v45, 16  ;;  %v646_v50 = vshll.u32 %v1858_v45, 16  ;;  %v751_v51 = vrot.slane %v566_v37, 1 }
  0x30   : > { %699 = vrot.lane.b32.xlu0 %v630_v32, %s1680_s17  ;;  %v754_v52 = vrot.slane %v567_v40, 1  ;;  %v653_v53 = vrot.slane %v651_v42, 1  ;;  %v656_v54 = vshrl.u32 %v1862_v46, 16  ;;  %v658_v55 = vshll.u32 %v1862_v46, 16 }
  0x31   : > { %v665_v56 = vrot.slane %v663_v43, 1  ;;  %v648_v57 = vrot.slane %v646_v50, 1  ;;  %v519_v58 = vor.u32 %v517_v35, %v516_v47  ;;  %v568_v59 = vsel %vm1765_vm4, %v516_v47, 0 }
  0x32   : > { %v523_v60 = vrot.slane %v521_v44, 7  ;;  %v660_v61 = vrot.slane %v658_v55, 1  ;;  %v750_v62 = vrot.slane %v1858_v45, 1  ;;  %v753_v0 = vrot.slane %v1862_v46, 1  ;;  %v1637_v55 = vld [vmem:[%s2044_s2 + $0x8] sm:$0xff]  }
  0x33   : > { %772 = vrot.lane.b32.xlu1 %v749_v34, %s1679_s11  ;;  %v675_v1 = vshll.u32 %v568_v59, 16  ;;  %v649_v2 = vor.u32 %v648_v57, %v644_v49  ;;  %v1876_v3 = vsel %vm1765_vm4, 0, %v519_v58  ;;  %v458_v26 = vshrl.u32 %v1635_v11, 16 }
  0x34   : > { %770 = vrot.lane.b32.xlu0 %v746_v27, %s1679_s11  ;;  %v526_v4 = vor.u32 %v524_v48, %v523_v60  ;;  %v569_v5 = vsel %vm1765_vm4, %v523_v60, 0  ;;  %v661_v6 = vor.u32 %v660_v61, %v656_v54  ;;  %v668_v7 = vshrl.u32 %v1876_v3, 16  ;;  %v1636_v54 = vld [vmem:[%s2044_s2] sm:$0xff]  }
  0x35   : > { %v670_v8 = vshll.u32 %v1876_v3, 16  ;;  %v654_v12 = vsel %vm570_vm3, %v649_v2, %v653_v53  ;;  %v687_v14 = vshll.u32 %v569_v5, 16  ;;  %v752_v19 = vsel %vm731_vm2, %v750_v62, %v751_v51  ;;  %1552 = vmatprep.subr.bf16.mxu0 %v1636_v54  ;;  %1574 = vmatprep.subr.bf16.mxu1 %v1636_v54 }
  0x36   : > { %v1886_v13 = vsel %vm1765_vm4, 0, %v526_v4  ;;  %v666_v15 = vsel %vm570_vm3, %v661_v6, %v665_v56  ;;  %v755_v20 = vsel %vm731_vm2, %v753_v0, %v754_v52  ;;  %v677_v21 = vrot.slane %v675_v1, 1  ;;  %1553 = vmatpush3.bf16.msra.mxu0 %v1636_v54  ;;  %1577 = vmatpush3.bf16.msra.mxu1 %v1636_v54  ;;  %v1638_v56 = vld [vmem:[%s2044_s2 + $0x10] ss:$0 sps:$4 sm:$0x33]  }
  0x37   : > { %v672_v16 = vrot.slane %v670_v8, 1  ;;  %v680_v17 = vshrl.u32 %v1886_v13, 16  ;;  %v682_v18 = vshll.u32 %v1886_v13, 16  ;;  %705 = vrot.lane.b32.xlu1 %v666_v15, %s1680_s17  ;;  %v689_v23 = vrot.slane %v687_v14, 1  ;;  %1554 = vmatprep.subr.bf16.mxu0 %v1637_v55 }
  0x38   : > { %703 = vrot.lane.b32.xlu0 %v654_v12, %s1680_s17  ;;  %v461_v27 = vshll.u32 %v1635_v11, 16  ;;  %v460_v29 = vrot.slane %v458_v26, 7  ;;  %v756_v32 = vrot.slane %v1876_v3, 1  ;;  %v757_v33 = vrot.slane %v568_v59, 1  ;;  %1575 = vmatprep.subr.bf16.mxu1 %v1637_v55 }
  0x39   : > { %v673_v24 = vor.u32 %v672_v16, %v668_v7  ;;  %v684_v25 = vrot.slane %v682_v18, 1  ;;  %v759_v34 = vrot.slane %v1886_v13, 1  ;;  %v760_v36 = vrot.slane %v569_v5, 1 }
  0x3a   : > { %v463_v37 = vor.u32 %v461_v27, %v460_v29  ;;  %v560_v38 = vsel %vm1765_vm4, %v460_v29, 0  ;;  %v758_v42 = vsel %vm731_vm2, %v756_v32, %v757_v33  ;;  %1555 = vmatpush3.bf16.msra.mxu0 %v1637_v55  ;;  %1578 = vmatpush3.bf16.msra.mxu1 %v1637_v55  ;;  %v938_v58 = vsel %vm936_vm5, %v1638_v56, 0 }
  0x3b   : > { %v685_v28 = vor.u32 %v684_v25, %v680_v17  ;;  %776 = vrot.lane.b32.xlu1 %v755_v20, %s1679_s11  ;;  %v678_v30 = vsel %vm570_vm3, %v673_v24, %v677_v21  ;;  %v579_v40 = vshll.u32 %v560_v38, 16  ;;  %v761_v47 = vsel %vm731_vm2, %v759_v34, %v760_v36  ;;  %1580 = vmatprep.subr.msk.bf16.mxu0 %vm936_vm5, %v1638_v56 }
  0x3c   : > { %774 = vrot.lane.b32.xlu0 %v752_v19, %s1679_s11  ;;  %v1906_v41 = vsel %vm1765_vm4, 0, %v463_v37  ;;  %v733_v49 = vrot.slane %v560_v38, 1  ;;  %1581 = vmatprep.subr.msk.bf16.mxu1 %vm936_vm5, %v1638_v56 }
  0x3d   : > { %v690_v35 = vsel %vm570_vm3, %v685_v28, %v689_v23  ;;  %v572_v43 = vshrl.u32 %v1906_v41, 16  ;;  %v574_v44 = vshll.u32 %v1906_v41, 16  ;;  %v732_v48 = vrot.slane %v1906_v41, 1 }
  0x3e   : > { %v581_v51 = vrot.slane %v579_v40, 1  ;;  %1557 = vmatpush3.bf16.msra.mxu0 %v938_v58  ;;  %1579 = vmatpush3.bf16.msra.mxu1 %v938_v58 }
  0x3f   : > { %709 = vrot.lane.b32.xlu1 %v690_v35, %s1680_s17  ;;  %v576_v50 = vrot.slane %v574_v44, 1  ;;  %v734_v52 = vsel %vm731_vm2, %v732_v48, %v733_v49 }
  0x40   : > { %707 = vrot.lane.b32.xlu0 %v678_v30, %s1680_s17 }
  0x41   : > { %v577_v10 = vor.u32 %v576_v50, %v572_v43 }
  0x43   : > { %780 = vrot.lane.b32.xlu1 %v761_v47, %s1679_s11  ;;  %v582_v53 = vsel %vm570_vm3, %v577_v10, %v581_v51 }
  0x44   : > { %778 = vrot.lane.b32.xlu0 %v758_v42, %s1679_s11 }
  0x47   : > { %762 = vrot.lane.b32.xlu1 %v734_v52, %s1679_s11  ;;  %s362_s11 = sadd.s32 %s1429_s26, %s2065_s10  ;;  %s374_s26 = sadd.s32 %s1437_s18, %s1777_s9 }
  0x48   : > { %691 = vrot.lane.b32.xlu0 %v582_v53, %s1680_s17  ;;  %s1436_s12 = sshll.u32 %s362_s11, 2  ;;  %s375_s25 = scalar_lea.vmem %s2046_s4, %s374_s26 }
  0x49   : > { %s2009_s15 = scalar_lea.vmem %s2045_s3, %s1436_s12  ;;  %s385_s29 = scalar_lea.vmem %s2047_s5, %s374_s26 }
  0x92   : > { %v765_v57 = vpop.permute.xlu1 %764 }
  0x96   : > { %v694_v59 = vpop.permute.xlu0 %693 }
  0x97   : > { %v786_v60 = vsel %vm782_vm6, %v1781_v22, %v694_v59 }
  0x98   : > { %v1932_v61 = vsel %vm803_vm7, %v786_v60, %v765_v57 }
  0x99   : > { %832 = vrot.lane.b32.xlu0 %v1932_v61, %s1681_s7  ;;  %v698_v0 = vpop.permute.xlu1 %697 }
  0x9a   : > { %v696_v62 = vpop.permute.xlu0 %695  ;;  %v790_v6 = vsel %vm782_vm6, %v1800_v39, %v698_v0 }
  0x9b   : > { %v788_v1 = vsel %vm782_vm6, %v1789_v31, %v696_v62 }
  0x9d   : > { %v769_v4 = vpop.permute.xlu1 %768 }
  0x9e   : > { %v767_v2 = vpop.permute.xlu0 %766  ;;  %v811_v8 = vsel %vm803_vm7, %v790_v6, %v769_v4 }
  0x9f   : > { %v809_v5 = vsel %vm803_vm7, %v788_v1, %v767_v2 }
  0xa0   : > { %849 = vrot.lane.b32.xlu0 %v809_v5, %s1682_s8  ;;  %834 = vrot.lane.b32.xlu1 %v809_v5, %s1681_s7 }
  0xa1   : > { %v702_v7 = vpop.permute.xlu1 %701 }
  0xa2   : > { %v700_v22 = vpop.permute.xlu0 %699  ;;  %v794_v14 = vsel %vm782_vm6, %v1836_v9, %v702_v7 }
  0xa3   : > { %v792_v31 = vsel %vm782_vm6, %v1825_v63, %v700_v22 }
  0xa4   : > { %836 = vrot.lane.b32.xlu0 %v811_v8, %s1681_s7  ;;  %851 = vrot.lane.b32.xlu1 %v811_v8, %s1682_s8 }
  0xa5   : > { %v773_v12 = vpop.permute.xlu1 %772 }
  0xa6   : > { %v771_v11 = vpop.permute.xlu0 %770  ;;  %v815_v17 = vsel %vm803_vm7, %v794_v14, %v773_v12 }
  0xa7   : > { %v813_v39 = vsel %vm803_vm7, %v792_v31, %v771_v11 }
  0xa8   : > { %853 = vrot.lane.b32.xlu0 %v813_v39, %s1682_s8  ;;  %838 = vrot.lane.b32.xlu1 %v813_v39, %s1681_s7 }
  0xa9   : > { %v706_v16 = vpop.permute.xlu1 %705 }
  0xaa   : > { %v704_v15 = vpop.permute.xlu0 %703  ;;  %v798_v9 = vsel %vm782_vm6, %v1862_v46, %v706_v16 }
  0xab   : > { %v796_v63 = vsel %vm782_vm6, %v1858_v45, %v704_v15 }
  0xac   : > { %840 = vrot.lane.b32.xlu0 %v815_v17, %s1681_s7  ;;  %855 = vrot.lane.b32.xlu1 %v815_v17, %s1682_s8 }
  0xad   : > { %v777_v19 = vpop.permute.xlu1 %776 }
  0xae   : > { %v775_v18 = vpop.permute.xlu0 %774  ;;  %v819_v24 = vsel %vm803_vm7, %v798_v9, %v777_v19 }
  0xaf   : > { %v817_v20 = vsel %vm803_vm7, %v796_v63, %v775_v18 }
  0xb0   : > { %857 = vrot.lane.b32.xlu0 %v817_v20, %s1682_s8  ;;  %842 = vrot.lane.b32.xlu1 %v817_v20, %s1681_s7 }
  0xb1   : > { %v710_v23 = vpop.permute.xlu1 %709 }
  0xb2   : > { %v708_v21 = vpop.permute.xlu0 %707  ;;  %v802_v46 = vsel %vm782_vm6, %v1886_v13, %v710_v23 }
  0xb3   : > { %v800_v45 = vsel %vm782_vm6, %v1876_v3, %v708_v21 }
  0xb4   : > { %844 = vrot.lane.b32.xlu0 %v819_v24, %s1681_s7  ;;  %859 = vrot.lane.b32.xlu1 %v819_v24, %s1682_s8 }
  0xb5   : > { %v781_v26 = vpop.permute.xlu1 %780 }
  0xb6   : > { %v779_v25 = vpop.permute.xlu0 %778  ;;  %v823_v29 = vsel %vm803_vm7, %v802_v46, %v781_v26 }
  0xb7   : > { %v821_v27 = vsel %vm803_vm7, %v800_v45, %v779_v25 }
  0xb8   : > { %861 = vrot.lane.b32.xlu0 %v821_v27, %s1682_s8  ;;  %846 = vrot.lane.b32.xlu1 %v821_v27, %s1681_s7 }
  0xb9   : > { %v763_v32 = vpop.permute.xlu1 %762 }
  0xba   : > { %v692_v28 = vpop.permute.xlu0 %691 }
  0xbb   : > { %v784_v30 = vsel %vm782_vm6, %v1906_v41, %v692_v28 }
  0xbc   : > { %863 = vrot.lane.b32.xlu1 %v823_v29, %s1682_s8  ;;  %v805_v3 = vsel %vm803_vm7, %v784_v30, %v763_v32 }
 0x10b   : > { %v833_v33 = vpop.permute.xlu0 %832 }
 0x10c   : > { %v867_v13 = vsel %vm865_vm8, %v805_v3, %v833_v33 }
 0x112   : > { %v835_v34 = vpop.permute.xlu1 %834  ;;  %v850_v35 = vpop.permute.xlu0 %849 }
 0x113   : > { %v884_v36 = vsel %vm882_vm9, %v867_v13, %v850_v35  ;;  %v869_v37 = vsel %vm865_vm8, %v1932_v61, %v835_v34 }
 0x114   : > { %1558 = vmatprep.mubr.msk.bf16.mxu0 %vm919_vm10, %v884_v36 }
 0x116   : > { %v852_v38 = vpop.permute.xlu1 %851  ;;  %v837_v40 = vpop.permute.xlu0 %836 }
 0x117   : > { %v886_v41 = vsel %vm882_vm9, %v869_v37, %v852_v38  ;;  %v871_v42 = vsel %vm865_vm8, %v809_v5, %v837_v40 }
 0x118   : > { %1559 = vmatmul.mubr.msk.bf16.vlgmr.msra.gmra.mrb[0].mxu0 %vm919_vm10, %v886_v41 }
 0x11a   : > { %v839_v43 = vpop.permute.xlu1 %838  ;;  %v854_v44 = vpop.permute.xlu0 %853 }
 0x11b   : > { %v888_v47 = vsel %vm882_vm9, %v871_v42, %v854_v44  ;;  %v873_v48 = vsel %vm865_vm8, %v811_v8, %v839_v43 }
 0x11c   : > { %1562 = vmatprep.mubr.msk.bf16.mxu0 %vm919_vm10, %v888_v47 }
 0x11e   : > { %v856_v49 = vpop.permute.xlu1 %855  ;;  %v841_v50 = vpop.permute.xlu0 %840 }
 0x11f   : > { %v890_v51 = vsel %vm882_vm9, %v873_v48, %v856_v49  ;;  %v875_v10 = vsel %vm865_vm8, %v813_v39, %v841_v50 }
 0x120   : > { %1563 = vmatmul.mubr.msk.bf16.gmra.mrb[4].mxu0 %vm919_vm10, %v890_v51 }
 0x122   : > { %v843_v52 = vpop.permute.xlu1 %842  ;;  %v858_v53 = vpop.permute.xlu0 %857 }
 0x123   : > { %v892_v54 = vsel %vm882_vm9, %v875_v10, %v858_v53  ;;  %v877_v55 = vsel %vm865_vm8, %v815_v17, %v843_v52 }
 0x124   : > { %1566 = vmatprep.mubr.msk.bf16.mxu1 %vm919_vm10, %v892_v54 }
 0x126   : > { %v860_v56 = vpop.permute.xlu1 %859  ;;  %v845_v57 = vpop.permute.xlu0 %844 }
 0x127   : > { %v894_v58 = vsel %vm882_vm9, %v877_v55, %v860_v56  ;;  %v879_v59 = vsel %vm865_vm8, %v817_v20, %v845_v57 }
 0x128   : > { %1567 = vmatmul.mubr.msk.bf16.vlgmr.msra.gmra.mrb[0].mxu1 %vm919_vm10, %v894_v58 }
 0x12a   : > { %v847_v60 = vpop.permute.xlu1 %846  ;;  %v862_v61 = vpop.permute.xlu0 %861 }
 0x12b   : > { %v896_v62 = vsel %vm882_vm9, %v879_v59, %v862_v61  ;;  %v881_v0 = vsel %vm865_vm8, %v819_v24, %v847_v60 }
 0x12c   : > { %1570 = vmatprep.mubr.msk.bf16.mxu1 %vm919_vm10, %v896_v62 }
 0x12e   : > { %v864_v1 = vpop.permute.xlu1 %863 }
 0x12f   : > { %v898_v2 = vsel %vm882_vm9, %v881_v0, %v864_v1 }
 0x130   : > { %1571 = vmatmul.mubr.msk.bf16.gmra.mrb[4].mxu1 %vm919_vm10, %v898_v2 }
 0x1eb   : > { %v1560_v4 = vpop.f32.mrb[0].mxu0 }
 0x1ec   : > { %v974_v5 = vpop.f32.mrb[1].mxu0  ;;  %v1141_v39 = vmul.f32 %v1560_v4, %v1560_v4 }
 0x1ed   : > { %v1561_v6 = vpop.f32.mrb[2].mxu0  ;;  %v1139_v8 = vmul.f32 %v974_v5, %v974_v5 }
 0x1ee   : > { %v1502_v22 = vpack.c.bf16 %v1561_v6, %v1560_v4  ;;  %v977_v7 = vpop.f32.mrb[3].mxu0  ;;  %v1142_v16 = vmul.f32 %v1561_v6, %v1561_v6 }
 0x1ef   : > { %v1497_v31 = vpack.c.bf16 %v977_v7, %v974_v5  ;;  %v1117_v11 = vadd.f32 %v977_v7, %v974_v5  ;;  %v1140_v12 = vmul.f32 %v977_v7, %v977_v7 }
 0x1f0   : > { %1534 = vst [vmem:[%s2009_s15 + $0x8] sm:$0xff] %v1502_v22  }
 0x1f1   : > { %1498 = vst [vmem:[%s2009_s15] sm:$0xff] %v1497_v31   ;;  %v1118_v14 = vadd.f32 %v1560_v4, %v1117_v11  ;;  %v1155_v15 = vadd.f32 %v1140_v12, %v1139_v8 }
 0x1f3   : > { %v1156_v17 = vadd.f32 %v1155_v15, %v1141_v39  ;;  %v1564_v63 = vpop.f32.mrb[4].mxu0  ;;  %v1119_v18 = vadd.f32 %v1561_v6, %v1118_v14 }
 0x1f4   : > { %v990_v19 = vpop.f32.mrb[5].mxu0  ;;  %v1145_v28 = vmul.f32 %v1564_v63, %v1564_v63 }
 0x1f5   : > { %v1120_v20 = vadd.f32 %v1119_v18, %v990_v19  ;;  %v1143_v9 = vmul.f32 %v990_v19, %v990_v19  ;;  %v1157_v21 = vadd.f32 %v1156_v17, %v1142_v16  ;;  %v1565_v23 = vpop.f32.mrb[6].mxu0 }
 0x1f6   : > { %v1512_v24 = vpack.c.bf16 %v1565_v23, %v1564_v63  ;;  %v993_v45 = vpop.f32.mrb[7].mxu0  ;;  %v1146_v32 = vmul.f32 %v1565_v23, %v1565_v23 }
 0x1f7   : > { %v1158_v25 = vadd.f32 %v1157_v21, %v1143_v9  ;;  %v1507_v26 = vpack.c.bf16 %v993_v45, %v990_v19  ;;  %v1121_v27 = vadd.f32 %v1120_v20, %v993_v45  ;;  %v1144_v46 = vmul.f32 %v993_v45, %v993_v45 }
 0x1f8   : > { %1536 = vst [vmem:[%s2009_s15 + $0x18] sm:$0xff] %v1512_v24  }
 0x1f9   : > { %1535 = vst [vmem:[%s2009_s15 + $0x10] sm:$0xff] %v1507_v26   ;;  %v1122_v29 = vadd.f32 %v1564_v63, %v1121_v27  ;;  %v1159_v30 = vadd.f32 %v1158_v25, %v1144_v46 }
 0x1fb   : > { %v1160_v3 = vadd.f32 %v1159_v30, %v1145_v28  ;;  %v1568_v33 = vpop.f32.mrb[0].mxu1  ;;  %v1123_v13 = vadd.f32 %v1565_v23, %v1122_v29 }
 0x1fc   : > { %v1006_v34 = vpop.f32.mrb[1].mxu1  ;;  %v1149_v48 = vmul.f32 %v1568_v33, %v1568_v33 }
 0x1fd   : > { %v1124_v35 = vadd.f32 %v1123_v13, %v1006_v34  ;;  %v1147_v36 = vmul.f32 %v1006_v34, %v1006_v34  ;;  %v1161_v37 = vadd.f32 %v1160_v3, %v1146_v32  ;;  %v1569_v38 = vpop.f32.mrb[2].mxu1 }
 0x1fe   : > { %v1522_v40 = vpack.c.bf16 %v1569_v38, %v1568_v33  ;;  %v1009_v41 = vpop.f32.mrb[3].mxu1  ;;  %v1150_v51 = vmul.f32 %v1569_v38, %v1569_v38 }
 0x1ff   : > { %v1162_v42 = vadd.f32 %v1161_v37, %v1147_v36  ;;  %v1517_v43 = vpack.c.bf16 %v1009_v41, %v1006_v34  ;;  %v1125_v44 = vadd.f32 %v1124_v35, %v1009_v41  ;;  %v1148_v47 = vmul.f32 %v1009_v41, %v1009_v41 }
 0x200   : > { %1538 = vst [vmem:[%s2009_s15 + $0x28] sm:$0xff] %v1522_v40  }
 0x201   : > { %1537 = vst [vmem:[%s2009_s15 + $0x20] sm:$0xff] %v1517_v43   ;;  %v1126_v49 = vadd.f32 %v1568_v33, %v1125_v44  ;;  %v1163_v50 = vadd.f32 %v1162_v42, %v1148_v47 }
 0x203   : > { %v1164_v10 = vadd.f32 %v1163_v50, %v1149_v48  ;;  %v1572_v52 = vpop.f32.mrb[4].mxu1  ;;  %v1127_v53 = vadd.f32 %v1569_v38, %v1126_v49 }
 0x204   : > { %v1022_v54 = vpop.f32.mrb[5].mxu1  ;;  %v1153_v2 = vmul.f32 %v1572_v52, %v1572_v52 }
 0x205   : > { %v1128_v55 = vadd.f32 %v1127_v53, %v1022_v54  ;;  %v1151_v56 = vmul.f32 %v1022_v54, %v1022_v54  ;;  %v1165_v57 = vadd.f32 %v1164_v10, %v1150_v51  ;;  %v1573_v58 = vpop.f32.mrb[6].mxu1 }
 0x206   : > { %v1532_v59 = vpack.c.bf16 %v1573_v58, %v1572_v52  ;;  %v1025_v60 = vpop.f32.mrb[7].mxu1  ;;  %v1154_v6 = vmul.f32 %v1573_v58, %v1573_v58 }
 0x207   : > { %v1166_v61 = vadd.f32 %v1165_v57, %v1151_v56  ;;  %v1527_v62 = vpack.c.bf16 %v1025_v60, %v1022_v54  ;;  %v1129_v0 = vadd.f32 %v1128_v55, %v1025_v60  ;;  %v1152_v1 = vmul.f32 %v1025_v60, %v1025_v60 }
 0x208   : > { %1540 = vst [vmem:[%s2009_s15 + $0x38] sm:$0xff] %v1532_v59  }
 0x209   : > { %1539 = vst [vmem:[%s2009_s15 + $0x30] sm:$0xff] %v1527_v62   ;;  %v1130_v4 = vadd.f32 %v1572_v52, %v1129_v0  ;;  %v1167_v5 = vadd.f32 %v1166_v61, %v1152_v1 }
 0x20b   : > { %v1131_v22 = vadd.f32 %v1573_v58, %v1130_v4  ;;  %v1168_v7 = vadd.f32 %v1167_v5, %v1153_v2 }
 0x20d   : > { %v1132_v8 = vrot.slane %v1131_v22, 4  ;;  %v1169_v31 = vadd.f32 %v1168_v7, %v1154_v6 }
 0x20f   : > { %v1133_v11 = vadd.f32 %v1132_v8, %v1131_v22  ;;  %v1170_v12 = vrot.slane %v1169_v31, 4 }
 0x211   : > { %v1134_v39 = vrot.slane %v1133_v11, 2  ;;  %v1171_v14 = vadd.f32 %v1170_v12, %v1169_v31 }
 0x213   : > { %v1135_v15 = vadd.f32 %v1134_v39, %v1133_v11  ;;  %v1172_v16 = vrot.slane %v1171_v14, 2 }
 0x215   : > { %v1136_v17 = vrot.slane %v1135_v15, 1  ;;  %v1173_v63 = vadd.f32 %v1172_v16, %v1171_v14 }
 0x217   : > { %v1137_v18 = vadd.f32 %v1136_v17, %v1135_v15  ;;  %v1174_v19 = vrot.slane %v1173_v63, 1 }
 0x219   : > { %1138 = vst [vmem:[%s375_s25] sm:$0x1] %v1137_v18  ;;  %v1175_v20 = vadd.f32 %v1174_v19, %v1173_v63 }
 0x21b   : > { %1176 = vst [vmem:[%s385_s29] sm:$0x1] %v1175_v20 }
 0x21c PF: > { %s16_s22 = sadd.s32 1, %s1677_s22   ;;  %s2050_s18 = smov %s1669_s20 }
 0x21d   : > { %p13_p9 = scmp.ge.s32.totalorder %s16_s22, 6   ;;  %s2051_s19 = smov %s1673_s21 }
 0x21e   : > { %s2052_s20 = smov %s2055_s23  ;;  %s2053_s21 = smov %s2059_s24 }
 0x21f   :  { %15 = sbr.rel (!%p13_p9) target bundleno = 3 (0x3), region = 92 }

</bundles_post_ra>
